<compile_context>
chip_gen: v7x
topology: tpu7x:2x2x1
jax: 0.10.0
libtpu: 0.0.40
codegen_flags: <defaults>
</compile_context>

<pallas_src>
import jax
import jax.numpy as jnp
from jax.experimental import pallas as pl
from jax.experimental.pallas import tpu as pltpu

_LANE = 128          # lane width: last-dim alignment for lane-dense vregs / unmasked stores
_SUBLANE = 8         # sublane width: second-to-last-dim alignment
_TB_MAX = 512        # upper bound on batch-tile rows (multiple of 8)
_VMEM_BUDGET = 24 << 20   # conservative per-kernel VMEM budget (bytes)


def _round_up(x, m):
    return ((x + m - 1) // m) * m


def _pad2d(a, rows, cols):
    r, c = a.shape
    if r == rows and c == cols:
        return a
    return jnp.pad(a, ((0, rows - r), (0, cols - c)))


def _pick_batch_tile(B_p, S_p, H_p, A_p):
    """Largest batch tile (multiple of 8, <= _TB_MAX) fitting the VMEM budget."""
    # Resident once: bf16 weights + f32 biases.
    resident = 2 * (S_p * H_p + H_p * H_p + H_p * A_p) + 4 * (2 * H_p + A_p)
    tb = min(_TB_MAX, B_p)
    while tb > _SUBLANE:
        per_tile = (2 * tb * S_p * 2        # bf16 x tile, double-buffered
                    + 2 * tb * A_p * 4      # f32 out tile, double-buffered
                    + 2 * tb * H_p * 4)     # f32 h1/h2 intermediates
        if resident + per_tile <= _VMEM_BUDGET:
            break
        tb //= 2
    return max(tb, _SUBLANE)


def _policy_kernel(scale_ref, x_ref, w1_ref, b1_ref, w2_ref, b2_ref,
                   w3_ref, b3_ref, o_ref):
    # Layer 1: bf16 x bf16 matmul on the MXU, f32 accumulate; bias + ReLU in f32 (VPU).
    h1 = jnp.dot(x_ref[...], w1_ref[...], preferred_element_type=jnp.float32)
    h1 = jnp.maximum(h1 + b1_ref[...], 0.0)
    # Layer 2
    h2 = jnp.dot(h1.astype(jnp.bfloat16), w2_ref[...],
                 preferred_element_type=jnp.float32)
    h2 = jnp.maximum(h2 + b2_ref[...], 0.0)
    # Layer 3 -> tanh (EUP) -> scale; max_action read from SMEM (no recompile per value).
    mu = jnp.dot(h2.astype(jnp.bfloat16), w3_ref[...],
                 preferred_element_type=jnp.float32)
    mu = mu + b3_ref[...]
    o_ref[...] = jnp.tanh(mu) * scale_ref[0]


def policy_forward(x, params, max_action):
    """x: (B, state_dim) f32. params: weights stored as (in_dim, out_dim), biases (1, out_dim)."""
    w1, b1 = params["w1"], params["b1"]
    w2, b2 = params["w2"], params["b2"]
    w3, b3 = params["w3"], params["b3"]

    B, S = x.shape
    H = w1.shape[1]
    A = w3.shape[1]

    # Lane-align feature dims (128); pad batch to a sublane multiple and to a whole
    # number of batch tiles. Zero padding is exact and sliced away before returning.
    S_p = _round_up(S, _LANE)
    H_p = _round_up(H, _LANE)
    A_p = _round_up(A, _LANE)

    B_p = _round_up(B, _SUBLANE)
    tb = _pick_batch_tile(B_p, S_p, H_p, A_p)
    B_p = _round_up(B_p, tb)
    grid = (B_p // tb,)

    # One-time padding / dtype prep in the wrapper. Weights & activations -> bf16
    # for the MXU; biases stay f32 for the f32 VPU bias-add.
    x_p = _pad2d(x, B_p, S_p).astype(jnp.bfloat16)
    w1_p = _pad2d(w1, S_p, H_p).astype(jnp.bfloat16)
    w2_p = _pad2d(w2, H_p, H_p).astype(jnp.bfloat16)
    w3_p = _pad2d(w3, H_p, A_p).astype(jnp.bfloat16)
    b1_p = _pad2d(b1, 1, H_p).astype(jnp.float32)
    b2_p = _pad2d(b2, 1, H_p).astype(jnp.float32)
    b3_p = _pad2d(b3, 1, A_p).astype(jnp.float32)
    scale = jnp.asarray([max_action], jnp.float32)

    const = lambda i: (0, 0)   # weights / biases: same block every step (VMEM-resident)

    out_p = pl.pallas_call(
        _policy_kernel,
        out_shape=jax.ShapeDtypeStruct((B_p, A_p), jnp.float32),
        grid=grid,
        in_specs=[
            pl.BlockSpec(memory_space=pltpu.MemorySpace.SMEM),  # max_action scalar
            pl.BlockSpec((tb, S_p), lambda i: (i, 0)),          # x batch tile (pipelined)
            pl.BlockSpec((S_p, H_p), const),                    # w1
            pl.BlockSpec((1, H_p), const),                      # b1
            pl.BlockSpec((H_p, H_p), const),                    # w2
            pl.BlockSpec((1, H_p), const),                      # b2
            pl.BlockSpec((H_p, A_p), const),                    # w3
            pl.BlockSpec((1, A_p), const),                      # b3
        ],
        out_specs=pl.BlockSpec((tb, A_p), lambda i: (i, 0)),    # lane-dense output tile
        compiler_params=pltpu.CompilerParams(
            dimension_semantics=("parallel",)),                 # megacore split on v7x
    )(scale, x_p, w1_p, b1_p, w2_p, b2_p, w3_p, b3_p)

    return out_p[:B, :A]


def init_params(key, state_dim, action_dim, hidden_size):
    """Deterministic synthetic params. Weights kept as (in_dim, out_dim) = PyTorch W^T."""
    ks = jax.random.split(key, 6)

    def lin(kw, kb, fan_in, fan_out):
        bound = 1.0 / jnp.sqrt(fan_in)
        w = jax.random.uniform(kw, (fan_in, fan_out), jnp.float32, -bound, bound)
        b = jax.random.uniform(kb, (1, fan_out), jnp.float32, -bound, bound)
        return w, b

    w1, b1 = lin(ks[0], ks[1], state_dim, hidden_size)
    w2, b2 = lin(ks[2], ks[3], hidden_size, hidden_size)
    w3, b3 = lin(ks[4], ks[5], hidden_size, action_dim)
    return {"w1": w1, "b1": b1, "w2": w2, "b2": b2, "w3": w3, "b3": b3}


def policy_reference(x, params, max_action):
    """Pure-JAX reference mirroring the kernel's bf16-operand / f32-accumulate numerics."""
    bf = lambda a: a.astype(jnp.bfloat16).astype(jnp.float32)
    h1 = jnp.maximum(bf(x) @ bf(params["w1"]) + params["b1"], 0.0)
    h2 = jnp.maximum(bf(h1) @ bf(params["w2"]) + params["b2"], 0.0)
    mu = bf(h2) @ bf(params["w3"]) + params["b3"]
    return jnp.tanh(mu) * max_action


def policy_reference_f32(x, params, max_action):
    """Full-precision reference of the original PyTorch module."""
    h1 = jnp.maximum(x @ params["w1"] + params["b1"], 0.0)
    h2 = jnp.maximum(h1 @ params["w2"] + params["b2"], 0.0)
    mu = h2 @ params["w3"] + params["b3"]
    return jnp.tanh(mu) * max_action


if __name__ == "__main__":
    key = jax.random.PRNGKey(0)
    k_x, k_p = jax.random.split(key)

    batch = 2
    state_dim = 16
    action_dim = 4
    hidden_size = 32
    max_action = 2.5

    x = jax.random.normal(k_x, (batch, state_dim), jnp.float32)
    params = init_params(k_p, state_dim, action_dim, hidden_size)

    out = policy_forward(x, params, max_action)
    out = jax.block_until_ready(out)

    assert out.shape == (batch, action_dim)

    ref_bf16 = policy_reference(x, params, max_action)        # mirrors kernel numerics
    ref_f32 = policy_reference_f32(x, params, max_action)     # original-module numerics
    assert jnp.allclose(out, ref_bf16, atol=2e-2, rtol=2e-2)
    assert jnp.allclose(out, ref_f32, atol=5e-2, rtol=5e-2)   # bf16-vs-f32 tolerance

    print("KERNEL_OK")
</pallas_src>

<mosaic_0001>
module attributes {stable_mosaic.version = 11 : i64} {
  func.func @_policy_kernel(%arg0: i32, %arg1: memref<1xf32, #tpu.memory_space<smem>>, %arg2: memref<8x128xbf16, #tpu.memory_space<vmem>>, %arg3: memref<128x128xbf16, #tpu.memory_space<vmem>>, %arg4: memref<1x128xf32, #tpu.memory_space<vmem>>, %arg5: memref<128x128xbf16, #tpu.memory_space<vmem>>, %arg6: memref<1x128xf32, #tpu.memory_space<vmem>>, %arg7: memref<128x128xbf16, #tpu.memory_space<vmem>>, %arg8: memref<1x128xf32, #tpu.memory_space<vmem>>, %arg9: memref<8x128xf32, #tpu.memory_space<vmem>>) attributes {dimension_semantics = [#tpu.dimension_semantics<parallel>], iteration_bounds = array<i64: 1>, scalar_prefetch = 0 : i64, scratch_operands = 0 : i64, tpu.core_type = #tpu.core_type<tc>, window_params = [{transform_indices = @transform_0, window_bounds = array<i64: 1>}, {transform_indices = @transform_1, window_bounds = array<i64: 8, 128>}, {pipeline_mode = #tpu.pipeline_mode<synchronous>, transform_indices = @transform_2, window_bounds = array<i64: 128, 128>}, {pipeline_mode = #tpu.pipeline_mode<synchronous>, transform_indices = @transform_3, window_bounds = array<i64: 1, 128>}, {pipeline_mode = #tpu.pipeline_mode<synchronous>, transform_indices = @transform_4, window_bounds = array<i64: 128, 128>}, {pipeline_mode = #tpu.pipeline_mode<synchronous>, transform_indices = @transform_5, window_bounds = array<i64: 1, 128>}, {pipeline_mode = #tpu.pipeline_mode<synchronous>, transform_indices = @transform_6, window_bounds = array<i64: 128, 128>}, {pipeline_mode = #tpu.pipeline_mode<synchronous>, transform_indices = @transform_7, window_bounds = array<i64: 1, 128>}, {transform_indices = @transform_8, window_bounds = array<i64: 8, 128>}]} {
    %c0 = arith.constant 0 : index
    %c0_0 = arith.constant 0 : index
    %0 = vector.load %arg2[%c0, %c0_0] : memref<8x128xbf16, #tpu.memory_space<vmem>>, vector<8x128xbf16>
    %c0_1 = arith.constant 0 : index
    %c0_2 = arith.constant 0 : index
    %1 = vector.load %arg3[%c0_1, %c0_2] : memref<128x128xbf16, #tpu.memory_space<vmem>>, vector<128x128xbf16>
    %cst = arith.constant dense<0.000000e+00> : vector<8x128xf32>
    %2 = tpu.matmul %0, %1, %cst {dimension_numbers = #tpu.dot_dimension_numbers<[1], [0], [0], [1], [0, 0, 1, 1], [], []>} : vector<8x128xbf16>, vector<128x128xbf16>, vector<8x128xf32> -> vector<8x128xf32>
    %c0_3 = arith.constant 0 : index
    %c0_4 = arith.constant 0 : index
    %3 = vector.load %arg4[%c0_3, %c0_4] : memref<1x128xf32, #tpu.memory_space<vmem>>, vector<1x128xf32>
    %4 = vector.broadcast %3 : vector<1x128xf32> to vector<8x128xf32>
    %5 = arith.addf %2, %4 : vector<8x128xf32>
    %cst_5 = arith.constant 0.000000e+00 : f32
    %6 = vector.broadcast %cst_5 : f32 to vector<8x128xf32>
    %7 = arith.maximumf %5, %6 : vector<8x128xf32>
    %8 = arith.truncf %7 : vector<8x128xf32> to vector<8x128xbf16>
    %c0_6 = arith.constant 0 : index
    %c0_7 = arith.constant 0 : index
    %9 = vector.load %arg5[%c0_6, %c0_7] : memref<128x128xbf16, #tpu.memory_space<vmem>>, vector<128x128xbf16>
    %cst_8 = arith.constant dense<0.000000e+00> : vector<8x128xf32>
    %10 = tpu.matmul %8, %9, %cst_8 {dimension_numbers = #tpu.dot_dimension_numbers<[1], [0], [0], [1], [0, 0, 1, 1], [], []>} : vector<8x128xbf16>, vector<128x128xbf16>, vector<8x128xf32> -> vector<8x128xf32>
    %c0_9 = arith.constant 0 : index
    %c0_10 = arith.constant 0 : index
    %11 = vector.load %arg6[%c0_9, %c0_10] : memref<1x128xf32, #tpu.memory_space<vmem>>, vector<1x128xf32>
    %12 = vector.broadcast %11 : vector<1x128xf32> to vector<8x128xf32>
    %13 = arith.addf %10, %12 : vector<8x128xf32>
    %cst_11 = arith.constant 0.000000e+00 : f32
    %14 = vector.broadcast %cst_11 : f32 to vector<8x128xf32>
    %15 = arith.maximumf %13, %14 : vector<8x128xf32>
    %16 = arith.truncf %15 : vector<8x128xf32> to vector<8x128xbf16>
    %c0_12 = arith.constant 0 : index
    %c0_13 = arith.constant 0 : index
    %17 = vector.load %arg7[%c0_12, %c0_13] : memref<128x128xbf16, #tpu.memory_space<vmem>>, vector<128x128xbf16>
    %cst_14 = arith.constant dense<0.000000e+00> : vector<8x128xf32>
    %18 = tpu.matmul %16, %17, %cst_14 {dimension_numbers = #tpu.dot_dimension_numbers<[1], [0], [0], [1], [0, 0, 1, 1], [], []>} : vector<8x128xbf16>, vector<128x128xbf16>, vector<8x128xf32> -> vector<8x128xf32>
    %c0_15 = arith.constant 0 : index
    %c0_16 = arith.constant 0 : index
    %19 = vector.load %arg8[%c0_15, %c0_16] : memref<1x128xf32, #tpu.memory_space<vmem>>, vector<1x128xf32>
    %20 = vector.broadcast %19 : vector<1x128xf32> to vector<8x128xf32>
    %21 = arith.addf %18, %20 : vector<8x128xf32>
    %22 = math.tanh %21 : vector<8x128xf32>
    %c0_17 = arith.constant 0 : index
    %23 = memref.load %arg1[%c0_17] : memref<1xf32, #tpu.memory_space<smem>>
    %24 = vector.broadcast %23 : f32 to vector<8x128xf32>
    %25 = arith.mulf %22, %24 : vector<8x128xf32>
    %c0_18 = arith.constant 0 : index
    %c0_19 = arith.constant 0 : index
    %26 = vector.load %arg9[%c0_18, %c0_19] : memref<8x128xf32, #tpu.memory_space<vmem>>, vector<8x128xf32>
    tpu.vector_store %arg9[%c0_18, %c0_19], %25 {strides = array<i32>} : memref<8x128xf32, #tpu.memory_space<vmem>>, vector<8x128xf32>,
    return
  }
  func.func @transform_0(%arg0: i32) -> i32 {
    %c0_i32 = arith.constant 0 : i32
    %c0_i32_0 = arith.constant 0 : i32
    return %c0_i32 : i32
  }
  func.func @transform_1(%arg0: i32) -> (i32, i32) {
    %c0_i32 = arith.constant 0 : i32
    %c0_i32_0 = arith.constant 0 : i32
    return %arg0, %c0_i32 : i32, i32
  }
  func.func @transform_2(%arg0: i32) -> (i32, i32) {
    %c0_i32 = arith.constant 0 : i32
    %c0_i32_0 = arith.constant 0 : i32
    %c0_i32_1 = arith.constant 0 : i32
    return %c0_i32, %c0_i32_0 : i32, i32
  }
  func.func @transform_3(%arg0: i32) -> (i32, i32) {
    %c0_i32 = arith.constant 0 : i32
    %c0_i32_0 = arith.constant 0 : i32
    %c0_i32_1 = arith.constant 0 : i32
    return %c0_i32, %c0_i32_0 : i32, i32
  }
  func.func @transform_4(%arg0: i32) -> (i32, i32) {
    %c0_i32 = arith.constant 0 : i32
    %c0_i32_0 = arith.constant 0 : i32
    %c0_i32_1 = arith.constant 0 : i32
    return %c0_i32, %c0_i32_0 : i32, i32
  }
  func.func @transform_5(%arg0: i32) -> (i32, i32) {
    %c0_i32 = arith.constant 0 : i32
    %c0_i32_0 = arith.constant 0 : i32
    %c0_i32_1 = arith.constant 0 : i32
    return %c0_i32, %c0_i32_0 : i32, i32
  }
  func.func @transform_6(%arg0: i32) -> (i32, i32) {
    %c0_i32 = arith.constant 0 : i32
    %c0_i32_0 = arith.constant 0 : i32
    %c0_i32_1 = arith.constant 0 : i32
    return %c0_i32, %c0_i32_0 : i32, i32
  }
  func.func @transform_7(%arg0: i32) -> (i32, i32) {
    %c0_i32 = arith.constant 0 : i32
    %c0_i32_0 = arith.constant 0 : i32
    %c0_i32_1 = arith.constant 0 : i32
    return %c0_i32, %c0_i32_0 : i32, i32
  }
  func.func @transform_8(%arg0: i32) -> (i32, i32) {
    %c0_i32 = arith.constant 0 : i32
    %c0_i32_0 = arith.constant 0 : i32
    return %arg0, %c0_i32 : i32, i32
  }
}

</mosaic_0001>

<bundles_post_ra>
// kernel: tpu_custom_call.1
= control target key start
LH: loop header
LB: loop body
LE: loop exit
PB: predicated region body
PF: predicated region fallthrough
CT: control target
= control target key end

     0   :  { %14 = vsyncpa [#allocation4], 0  ;;  %s877_s0 = inlined_call_operand.<no memory space> [shape: f32[1], index: 0, kind: input, shape index: {}]   ;;  %s878_s1 = inlined_call_operand.hbm [shape: bf16[8,128], index: 1, kind: input, shape index: {}]   ;;  %s879_s2 = inlined_call_operand.hbm [shape: bf16[128,128], index: 2, kind: input, shape index: {}]   ;;  %s880_s3 = inlined_call_operand.vmem [shape: f32[1,128], index: 3, kind: input, shape index: {}]   ;;  %s881_s4 = inlined_call_operand.hbm [shape: bf16[128,128], index: 4, kind: input, shape index: {}]   ;;  %s882_s5 = inlined_call_operand.vmem [shape: f32[1,128], index: 5, kind: input, shape index: {}]   ;;  %s883_s6 = inlined_call_operand.hbm [shape: bf16[128,128], index: 6, kind: input, shape index: {}]   ;;  %s884_s7 = inlined_call_operand.vmem [shape: f32[1,128], index: 7, kind: input, shape index: {}]   ;;  %s885_s8 = inlined_call_operand.hbm [shape: f32[8,128], index: 8, kind: output, shape index: {}]  }
   0x1   :  { %15 = vsyncpa [#allocation7], 0 }
   0x2   :  { %16 = vsyncpa [#allocation10], 0 }
   0x3   :  { %17 = vsyncpa [#allocation5], 0  ;;  %s712_s27 = smov [#allocation6]   ;;  %s594_s9 = scalar_lea.hbm %s879_s2, 1024 }
   0x4   :  { %s35_s28 = sshll.u32 %s712_s27, 4  ;;  %p595_p0 = scmp.ne.s32.totalorder %s879_s2, %s594_s9  ;;  %s36_s28 = int_to_ptr.vmem [resolvable:$true] %s35_s28 }
   0x5   :  { %p598_p1 = scmp.lt.u32.totalorder %s594_s9, %s879_s2 }
   0x7   :  { %p600_p2 = pnand %p598_p1, %p595_p0 }
   0x9   :  { %603 = shalt.err (!%p600_p2)
}
   0xa   :  { %s604_s14 = scalar_lea.vmem %s36_s28, 1024  ;;  %p609_p4 = scmp.lt.s32.totalorder %s36_s28, %s36_s28 }
   0xb   :  { %p605_p3 = scmp.ne.s32.totalorder %s36_s28, %s604_s14  ;;  %p610_p5 = scmp.lt.s32.totalorder %s604_s14, %s604_s14 }
   0xd   :  { %p611_p6 = por %p610_p5, %p609_p4 }
   0xf   :  { %p612_p7 = pnand %p611_p6, %p605_p3 }
  0x11   :  { %615 = shalt.err (!%p612_p7)
}
  0x12   :  { %s713_s15 = smov 64   ;;  %s714_s16 = smov 4  }
  0x13   :  { %41 = dma.hbm_to_vmem [thread:$0]  %s879_s2, 1024, %s36_s28, [#allocation7], %s713_s15, %s713_s15, %s714_s16  }
  0x14   :  { %s715_s19 = smov [#allocation3]   ;;  %s716_s21 = smov [#allocation8]  }
  0x15   :  { %s26_s20 = sshll.u32 %s715_s19, 4  ;;  %s49_s22 = sshll.u32 %s716_s21, 4  ;;  %s27_s20 = int_to_ptr.vmem [resolvable:$true] %s26_s20  ;;  %s50_s22 = int_to_ptr.vmem [resolvable:$true] %s49_s22 }
  0x16   :  { %s616_s25 = scalar_lea.hbm %s878_s1, 64 }
  0x17   :  { %p617_p8 = scmp.ne.s32.totalorder %s878_s1, %s616_s25  ;;  %p620_p9 = scmp.lt.u32.totalorder %s616_s25, %s878_s1 }
  0x19   :  { %p622_p10 = pnand %p620_p9, %p617_p8 }
  0x1b   :  { %625 = shalt.err (!%p622_p10)
}
  0x1c   :  { %s626_s2 = scalar_lea.vmem %s27_s20, 64  ;;  %p631_p12 = scmp.lt.s32.totalorder %s27_s20, %s27_s20 }
  0x1d   :  { %p627_p11 = scmp.ne.s32.totalorder %s27_s20, %s626_s2  ;;  %p632_p13 = scmp.lt.s32.totalorder %s626_s2, %s626_s2 }
  0x1f   :  { %p633_p0 = por %p632_p13, %p631_p12 }
  0x21   :  { %p634_p1 = pnand %p633_p0, %p627_p11 }
  0x23   :  { %637 = shalt.err (!%p634_p1)
}
  0x24   :  { %29 = dma.hbm_to_vmem [thread:$0]  %s878_s1, 64, %s27_s20, [#allocation4]  }
  0x25   :  { %s638_s12 = scalar_lea.hbm %s881_s4, 1024 }
  0x26   :  { %p639_p2 = scmp.ne.s32.totalorder %s881_s4, %s638_s12  ;;  %p642_p3 = scmp.lt.u32.totalorder %s638_s12, %s881_s4 }
  0x28   :  { %p644_p4 = pnand %p642_p3, %p639_p2 }
  0x2a   :  { %647 = shalt.err (!%p644_p4)
}
  0x2b   :  { %s648_s19 = scalar_lea.vmem %s50_s22, 1024  ;;  %p653_p6 = scmp.lt.s32.totalorder %s50_s22, %s50_s22 }
  0x2c   :  { %p649_p5 = scmp.ne.s32.totalorder %s50_s22, %s648_s19  ;;  %p654_p7 = scmp.lt.s32.totalorder %s648_s19, %s648_s19 }
  0x2e   :  { %p655_p8 = por %p654_p7, %p653_p6 }
  0x30   :  { %p656_p9 = pnand %p655_p8, %p649_p5 }
  0x32   :  { %659 = shalt.err (!%p656_p9)
}
  0x33   :  { %55 = dma.hbm_to_vmem [thread:$0]  %s881_s4, 1024, %s50_s22, [#allocation7], %s713_s15, %s713_s15, %s714_s16  }
  0x34   :  { %s717_s21 = smov [#allocation9]   ;;  %s660_s26 = scalar_lea.hbm %s883_s6, 1024 }
  0x35   :  { %s63_s23 = sshll.u32 %s717_s21, 4  ;;  %p661_p10 = scmp.ne.s32.totalorder %s883_s6, %s660_s26  ;;  %s64_s23 = int_to_ptr.vmem [resolvable:$true] %s63_s23 }
  0x36   :  { %p664_p11 = scmp.lt.u32.totalorder %s660_s26, %s883_s6 }
  0x38   :  { %p666_p12 = pnand %p664_p11, %p661_p10 }
  0x3a   :  { %669 = shalt.err (!%p666_p12)
}
  0x3b   :  { %s670_s28 = scalar_lea.vmem %s64_s23, 1024  ;;  %p675_p0 = scmp.lt.s32.totalorder %s64_s23, %s64_s23 }
  0x3c   :  { %p671_p13 = scmp.ne.s32.totalorder %s64_s23, %s670_s28  ;;  %p676_p1 = scmp.lt.s32.totalorder %s670_s28, %s670_s28 }
  0x3e   :  { %p677_p2 = por %p676_p1, %p675_p0 }
  0x40   :  { %p678_p3 = pnand %p677_p2, %p671_p13 }
  0x42   :  { %681 = shalt.err (!%p678_p3)
}
  0x43   :  { %69 = dma.hbm_to_vmem [thread:$0]  %s883_s6, 1024, %s64_s23, [#allocation10], %s713_s15, %s713_s15, %s714_s16  }
  0x44   :  { %704 = dma.done.wait [#allocation4], 64  }
  0x45   :  { %705 = vsyncadd [#allocation4], 4294967232 }
  0x46   :  { %706 = dma.done.wait [#allocation7], 2048  }
  0x47   :  { %707 = vsyncadd [#allocation7], 4294965248 }
  0x48   :  { %708 = dma.done.wait [#allocation10], 1024  }
  0x49   :  { %709 = vsyncadd [#allocation10], 4294966272  ;;  %v718_v0 = vmov 0.0   ;;  %vm719_vm0 = vmmov 0   ;;  %v568_v1 = vld [vmem:[#allocation6] sm:$0xff]   ;;  %v569_v2 = vld [vmem:[#allocation6 + $0x8] sm:$0xff]   ;;  %v425_v48 = vstv %s877_s0 }
  0x4a   :  { %499 = vmatprep.subr.bf16.mxu0 %v718_v0  ;;  %515 = vmatprep.mubr.msk.bf16.mxu0 %vm719_vm0, %v718_v0  ;;  %v570_v3 = vld [vmem:[#allocation6 + $0x10] sm:$0xff]   ;;  %v576_v4 = vld [vmem:[#allocation8] sm:$0xff]   ;;  %v571_v5 = vld [vmem:[#allocation6 + $0x18] sm:$0xff]   ;;  %s720_s12 = smov [#allocation11]  }
  0x4b   :  { %519 = vmatprep.subr.bf16.mxu1 %v718_v0  ;;  %535 = vmatprep.mubr.msk.bf16.mxu1 %vm719_vm0, %v718_v0  ;;  %v577_v6 = vld [vmem:[#allocation8 + $0x8] sm:$0xff]   ;;  %v572_v7 = vld [vmem:[#allocation6 + $0x20] sm:$0xff]   ;;  %v578_v8 = vld [vmem:[#allocation8 + $0x10] sm:$0xff]   ;;  %s434_s13 = sshll.u32 %s720_s12, 4  ;;  %s435_s13 = int_to_ptr.vmem [resolvable:$true] %s434_s13 }
  0x4c   :  { %500 = vmatpush3.bf16.msra.mxu0 %v568_v1  ;;  %520 = vmatpush3.bf16.msra.mxu1 %v576_v4  ;;  %v573_v9 = vld [vmem:[#allocation6 + $0x28] sm:$0xff]   ;;  %v579_v10 = vld [vmem:[#allocation8 + $0x18] sm:$0xff]   ;;  %v574_v11 = vld [vmem:[#allocation6 + $0x30] sm:$0xff]   ;;  %s682_s14 = scalar_lea.vmem %s435_s13, 128  ;;  %p687_p5 = scmp.lt.s32.totalorder %s435_s13, %s435_s13 }
  0x4d   :  { %501 = vmatprep.subr.bf16.mxu0 %v718_v0  ;;  %521 = vmatprep.subr.bf16.mxu1 %v718_v0  ;;  %v580_v12 = vld [vmem:[#allocation8 + $0x20] sm:$0xff]   ;;  %v575_v13 = vld [vmem:[#allocation6 + $0x38] sm:$0xff]   ;;  %v581_v14 = vld [vmem:[#allocation8 + $0x28] sm:$0xff]   ;;  %p683_p4 = scmp.ne.s32.totalorder %s435_s13, %s682_s14  ;;  %p688_p6 = scmp.lt.s32.totalorder %s682_s14, %s682_s14 }
  0x4e   :  { %v85_v15 = vld [vmem:[#allocation3] sm:$0xf]  ;;  %v582_v16 = vld [vmem:[#allocation8 + $0x30] sm:$0xff]   ;;  %v584_v18 = vld [vmem:[#allocation9] sm:$0xff]  }
  0x4f   :  { %v583_v17 = vld [vmem:[#allocation8 + $0x38] sm:$0xff]   ;;  %v585_v19 = vld [vmem:[#allocation9 + $0x8] sm:$0xff]   ;;  %v586_v20 = vld [vmem:[#allocation9 + $0x10] sm:$0xff]   ;;  %p689_p7 = por %p688_p6, %p687_p5 }
  0x50   :  { %502 = vmatpush3.bf16.msra.mxu0 %v569_v2  ;;  %522 = vmatpush3.bf16.msra.mxu1 %v577_v6  ;;  %v587_v21 = vld [vmem:[#allocation9 + $0x18] sm:$0xff]   ;;  %v588_v22 = vld [vmem:[#allocation9 + $0x20] sm:$0xff]   ;;  %v589_v23 = vld [vmem:[#allocation9 + $0x28] sm:$0xff]  }
  0x51   :  { %503 = vmatprep.subr.bf16.mxu0 %v718_v0  ;;  %523 = vmatprep.subr.bf16.mxu1 %v718_v0  ;;  %v445_v24 = vld [vmem:[%s880_s3] ss:$0 sm:$0xff]  ;;  %v590_v32 = vld [vmem:[#allocation9 + $0x30] sm:$0xff]   ;;  %p690_p8 = pnand %p689_p7, %p683_p4 }
  0x52   :  { %v591_v33 = vld [vmem:[#allocation9 + $0x38] sm:$0xff]  }
  0x53   :  { %v454_v34 = vld [vmem:[%s882_s5] ss:$0 sm:$0xff] }
  0x54   :  { %504 = vmatpush3.bf16.msra.mxu0 %v570_v3  ;;  %524 = vmatpush3.bf16.msra.mxu1 %v578_v8  ;;  %v463_v42 = vld [vmem:[%s884_s7] ss:$0 sm:$0xff] }
  0x55   :  { %505 = vmatprep.subr.bf16.mxu0 %v718_v0  ;;  %525 = vmatprep.subr.bf16.mxu1 %v718_v0 }
  0x58   :  { %506 = vmatpush3.bf16.msra.mxu0 %v571_v5  ;;  %526 = vmatpush3.bf16.msra.mxu1 %v579_v10 }
  0x59   :  { %507 = vmatprep.subr.bf16.mxu0 %v718_v0  ;;  %527 = vmatprep.subr.bf16.mxu1 %v718_v0 }
  0x5c   :  { %508 = vmatpush3.bf16.msra.mxu0 %v572_v7  ;;  %528 = vmatpush3.bf16.msra.mxu1 %v580_v12 }
  0x5d   :  { %509 = vmatprep.subr.bf16.mxu0 %v718_v0  ;;  %529 = vmatprep.subr.bf16.mxu1 %v718_v0 }
  0x60   :  { %510 = vmatpush3.bf16.msra.mxu0 %v573_v9  ;;  %530 = vmatpush3.bf16.msra.mxu1 %v581_v14 }
  0x61   :  { %511 = vmatprep.subr.bf16.mxu0 %v718_v0  ;;  %531 = vmatprep.subr.bf16.mxu1 %v718_v0 }
  0x64   :  { %512 = vmatpush3.bf16.msra.mxu0 %v574_v11  ;;  %532 = vmatpush3.bf16.msra.mxu1 %v582_v16 }
  0x65   :  { %513 = vmatprep.subr.bf16.mxu0 %v718_v0  ;;  %533 = vmatprep.subr.bf16.mxu1 %v718_v0 }
  0x68   :  { %514 = vmatpush3.bf16.msra.mxu0 %v575_v13  ;;  %534 = vmatpush3.bf16.msra.mxu1 %v583_v17 }
  0x69   :  { %539 = vmatprep.subr.bf16.mxu0 %v718_v0 }
  0x6b   :  { %516 = vmatmul.mubr.bf16.vlgmr.msra.gmra.mrb[0].mxu0 %v85_v15 }
  0x6c   :  { %555 = vmatprep.mubr.msk.bf16.mxu0 %vm719_vm0, %v718_v0  ;;  %540 = vmatpush3.bf16.msra.mxu0 %v584_v18 }
  0x6d   :  { %541 = vmatprep.subr.bf16.mxu0 %v718_v0 }
  0x70   :  { %542 = vmatpush3.bf16.msra.mxu0 %v585_v19 }
  0x71   :  { %543 = vmatprep.subr.bf16.mxu0 %v718_v0 }
  0x74   :  { %544 = vmatpush3.bf16.msra.mxu0 %v586_v20 }
  0x75   :  { %545 = vmatprep.subr.bf16.mxu0 %v718_v0 }
  0x78   :  { %546 = vmatpush3.bf16.msra.mxu0 %v587_v21 }
  0x79   :  { %547 = vmatprep.subr.bf16.mxu0 %v718_v0 }
  0x7c   :  { %548 = vmatpush3.bf16.msra.mxu0 %v588_v22 }
  0x7d   :  { %549 = vmatprep.subr.bf16.mxu0 %v718_v0 }
  0x80   :  { %550 = vmatpush3.bf16.msra.mxu0 %v589_v23 }
  0x81   :  { %551 = vmatprep.subr.bf16.mxu0 %v718_v0 }
  0x84   :  { %552 = vmatpush3.bf16.msra.mxu0 %v590_v32 }
  0x85   :  { %553 = vmatprep.subr.bf16.mxu0 %v718_v0 }
  0x88   :  { %554 = vmatpush3.bf16.msra.mxu0 %v591_v33 }
 0x13e   :  { %v191_v25 = vpop.f32.mrb[0].mxu0 }
 0x13f   :  { %v192_v26 = vadd.f32 %v445_v24, %v191_v25  ;;  %v517_v27 = vpop.f32.mrb[1].mxu0 }
 0x140   :  { %v194_v28 = vpop.f32.mrb[2].mxu0 }
 0x141   :  { %v197_v29 = vmax.f32 %v192_v26, 0.0  ;;  %v518_v30 = vpop.f32.mrb[3].mxu0 }
 0x143   :  { %v198_v31 = vpack.c.bf16 %v197_v29, %v197_v29 }
 0x145   :  { %536 = vmatmul.mubr.bf16.vlgmr.msra.gmra.mrb[0].mxu1 %v198_v31 }
 0x218   :  { %v304_v35 = vpop.f32.mrb[0].mxu1 }
 0x219   :  { %v305_v36 = vadd.f32 %v454_v34, %v304_v35  ;;  %v537_v37 = vpop.f32.mrb[1].mxu1 }
 0x21a   :  { %v307_v38 = vpop.f32.mrb[2].mxu1 }
 0x21b   :  { %v310_v39 = vmax.f32 %v305_v36, 0.0  ;;  %v538_v40 = vpop.f32.mrb[3].mxu1 }
 0x21d   :  { %v311_v41 = vpack.c.bf16 %v310_v39, %v310_v39 }
 0x21f   :  { %556 = vmatmul.mubr.bf16.vlgmr.msra.gmra.mrb[4].mxu0 %v311_v41 }
 0x2f2   :  { %v417_v43 = vpop.f32.mrb[4].mxu0 }
 0x2f3   :  { %v418_v44 = vadd.f32 %v463_v42, %v417_v43  ;;  %v557_v45 = vpop.f32.mrb[5].mxu0 }
 0x2f4   :  { %v420_v46 = vpop.f32.mrb[6].mxu0 }
 0x2f5   :  { %592 = vtanh.f32 %v418_v44  ;;  %v558_v47 = vpop.f32.mrb[7].mxu0 }
 0x2ff   :  { %v593_v49 = vpop.eup %592 }
 0x300   :  { %v426_v50 = vmul.f32 %v593_v49, %v425_v48 }
 0x302   :  { %427 = vst [vmem:[#allocation11] sm:$0xff] %v426_v50 }
 0x303   :  { %693 = shalt.err (!%p690_p8)
}
 0x304   :  { %s694_s18 = scalar_lea.hbm %s885_s8, 128 }
 0x305   :  { %p695_p9 = scmp.ne.s32.totalorder %s885_s8, %s694_s18  ;;  %p698_p10 = scmp.lt.u32.totalorder %s694_s18, %s885_s8 }
 0x307   :  { %p700_p11 = pnand %p698_p10, %p695_p9 }
 0x309   :  { %703 = shalt.err (!%p700_p11)
}
 0x30a   :  { %437 = dma.vmem_to_hbm [thread:$0]  %s435_s13, 128, %s885_s8, [#allocation5]  }
 0x30b   :  { %710 = dma.done.wait [#allocation5], 128  }
 0x30c   :  { %711 = vsyncadd [#allocation5], 4294967168 }
 0x30d   :  { %441 = vsyncpa [#allocation4], 1 }
 0x30e   :  { %442 = vsyncpa [#allocation7], 1 }
 0x30f   :  { %443 = vsyncpa [#allocation10], 1 }
 0x310   :  { %444 = vsyncpa [#allocation5], 1 }

</bundles_post_ra>
